<compile_context>
chip_gen: v7x
topology: tpu7x:2x2x1
jax: 0.10.0
libtpu: 0.0.40
codegen_flags: <defaults>
</compile_context>

<pallas_src>
import functools
import math

import jax
import jax.numpy as jnp
from jax import lax
from jax.experimental import pallas as pl
from jax.experimental.pallas import tpu as pltpu


def _mha_kernel(q_f32_ref, q_bf_ref, kp_ref, vp_ref,
                wq_ref, wfc_ref, gamma_ref, beta_ref,
                out_ref, attn_orig_ref, attn_ref,
                acc_ref, *, n_head, eps):
    """Grid = (batch, q-block, head).  Head is the (arbitrary) reduction axis."""
    h = pl.program_id(2)

    # Per-head Q projection; 1/sqrt(d_k) is pre-folded into wq by the wrapper.
    qh = jnp.dot(q_bf_ref[0], wq_ref[0],
                 preferred_element_type=jnp.float32)            # (tq, dk)

    # K/V per-head projections arrive pre-computed (wrapper) in bf16 — they
    # depend only on (b, h) and are never recomputed per q-block.
    kh = kp_ref[0, 0]                                           # (Lk, dk) bf16
    vh = vp_ref[0, 0]                                           # (Lk, dv) bf16

    # scores = (q / temperature) @ k^T  -> (tq, Lk)
    scores = lax.dot_general(
        qh.astype(jnp.bfloat16), kh,
        dimension_numbers=(((1,), (1,)), ((), ())),
        preferred_element_type=jnp.float32)

    attn_orig_ref[0, 0] = scores.astype(attn_orig_ref.dtype)    # pre-softmax scores
    # TODO(synk): apply mask (masked_fill with -1e9) here when a mask is given.

    # Softmax over keys (f32); attention dropout = identity (eval mode).
    m = jnp.max(scores, axis=-1, keepdims=True)
    e = jnp.exp(scores - m)
    denom = jnp.sum(e, axis=-1, keepdims=True)
    p = e * pl.reciprocal(denom, approx=True)

    attn_ref[0, 0] = p.astype(attn_ref.dtype)                   # post-softmax attn

    # This head's contribution to fc(concat over heads): (attn @ v) @ Wfc_h.
    oh = jnp.dot(p.astype(jnp.bfloat16), vh,
                 preferred_element_type=jnp.float32)             # (tq, dv)
    contrib = jnp.dot(oh.astype(jnp.bfloat16), wfc_ref[0],
                      preferred_element_type=jnp.float32)        # (tq, D)

    @pl.when(h == 0)
    def _():
        acc_ref[...] = jnp.zeros_like(acc_ref)

    acc_ref[...] += contrib

    @pl.when(h == n_head - 1)
    def _():
        # fc dropout = identity; residual add; LayerNorm (biased var, eps in sqrt).
        x = acc_ref[...] + q_f32_ref[0]
        mu = jnp.mean(x, axis=-1, keepdims=True)
        var = jnp.mean((x - mu) ** 2, axis=-1, keepdims=True)
        y = (x - mu) * lax.rsqrt(var + eps)
        out_ref[0] = (y * gamma_ref[...] + beta_ref[...]).astype(out_ref.dtype)


def _vmem_capacity_bytes():
    """Per-core VMEM capacity; conservative (v7x-sized) fallback if unknown."""
    try:
        info = pltpu.get_tpu_info()
        cap = int(getattr(info, "vmem_capacity_bytes", 0))
        if cap > 0:
            return cap
    except Exception:
        pass
    return 64 * 1024 * 1024


def multi_head_attention(q, k, v, params, *, n_head, d_k, d_v, eps=1e-6,
                         block_q=None, attn_dtype=jnp.bfloat16):
    """q, k, v: (B, L, d_model) float32.  Returns (out, attn_original, attn)."""
    B, Lq, D = q.shape
    Lk = k.shape[1]
    Lv = v.shape[1]
    assert Lk == Lv

    vmem_cap = _vmem_capacity_bytes()

    # Generation-aware q-block: 128 when VMEM is small (v7x 64 MiB/TC),
    # 256 when it is large (v5e/v6e 128 MiB).  Clamp to a divisor of Lq.
    if block_q is None:
        block_q = 256 if vmem_cap >= 100 * 1024 * 1024 else 128
        block_q = min(block_q, Lq)
    block_q = math.gcd(Lq, int(block_q))
    assert Lq % block_q == 0
    n_q_blocks = Lq // block_q

    inv_temp = 1.0 / (d_k ** 0.5)

    # Per-head weight slabs (head-major, matching the PyTorch .view split),
    # bf16 at the boundary.  1/sqrt(d_k) folded into wq (zero in-kernel cost).
    wq3 = jnp.transpose((params["w_qs"] * inv_temp).reshape(D, n_head, d_k),
                        (1, 0, 2)).astype(jnp.bfloat16)           # (H, D, dk)
    wfc3 = params["fc"].reshape(n_head, d_v, D).astype(jnp.bfloat16)  # (H, dv, D)
    gamma = params["ln_gamma"].reshape(1, D).astype(jnp.float32)
    beta = params["ln_beta"].reshape(1, D).astype(jnp.float32)

    # (1) Hoisted K/V projections: depend only on (b, h), so compute them once
    # here (lane-dense matmuls) and feed bf16 per-head slabs to the kernel.
    kp = jnp.transpose((k @ params["w_ks"]).reshape(B, Lk, n_head, d_k),
                       (0, 2, 1, 3)).astype(jnp.bfloat16)         # (B, H, Lk, dk)
    vp = jnp.transpose((v @ params["w_vs"]).reshape(B, Lv, n_head, d_v),
                       (0, 2, 1, 3)).astype(jnp.bfloat16)         # (B, H, Lk, dv)

    # (3) Cast Q once; keep the f32 copy only for the residual/LayerNorm path.
    q_bf = q.astype(jnp.bfloat16)

    kernel = functools.partial(_mha_kernel, n_head=n_head, eps=eps)

    out_shapes = (
        jax.ShapeDtypeStruct((B, Lq, D), jnp.float32),            # output
        jax.ShapeDtypeStruct((B, n_head, Lq, Lk), attn_dtype),    # attn_original
        jax.ShapeDtypeStruct((B, n_head, Lq, Lk), attn_dtype),    # attn
    )

    grid = (B, n_q_blocks, n_head)

    grid_spec = pltpu.PrefetchScalarGridSpec(
        num_scalar_prefetch=0,
        grid=grid,
        in_specs=[
            pl.BlockSpec((1, block_q, D), lambda b, qi, h: (b, qi, 0)),    # q f32
            pl.BlockSpec((1, block_q, D), lambda b, qi, h: (b, qi, 0)),    # q bf16
            pl.BlockSpec((1, 1, Lk, d_k), lambda b, qi, h: (b, h, 0, 0)),  # k proj
            pl.BlockSpec((1, 1, Lv, d_v), lambda b, qi, h: (b, h, 0, 0)),  # v proj
            pl.BlockSpec((1, D, d_k),     lambda b, qi, h: (h, 0, 0)),     # wq slab
            pl.BlockSpec((1, d_v, D),     lambda b, qi, h: (h, 0, 0)),     # fc slab
            pl.BlockSpec((1, D),          lambda b, qi, h: (0, 0)),        # ln gamma
            pl.BlockSpec((1, D),          lambda b, qi, h: (0, 0)),        # ln beta
        ],
        out_specs=[
            pl.BlockSpec((1, block_q, D),      lambda b, qi, h: (b, qi, 0)),
            pl.BlockSpec((1, 1, block_q, Lk),  lambda b, qi, h: (b, h, qi, 0)),
            pl.BlockSpec((1, 1, block_q, Lk),  lambda b, qi, h: (b, h, qi, 0)),
        ],
        scratch_shapes=[pltpu.VMEM((block_q, D), jnp.float32)],
    )

    # (7) VMEM budget from actual block bytes (x2 = double buffering) plus the
    # f32 softmax temporaries and a small headroom, capped below capacity.
    attn_bytes = jnp.dtype(attn_dtype).itemsize
    est = 0
    est += 2 * block_q * D * (4 + 2)             # q f32 + q bf16 blocks
    est += 2 * Lk * (d_k + d_v) * 2              # kp, vp per-head blocks (bf16)
    est += 2 * (D * d_k + d_v * D) * 2           # wq / fc slabs (bf16)
    est += 2 * 2 * D * 4                         # gamma, beta
    est += 2 * block_q * D * 4                   # output block
    est += 2 * 2 * block_q * Lk * attn_bytes     # two attention-map blocks
    est += block_q * D * 4                       # accumulator scratch
    est += 4 * block_q * Lk * 4                  # scores / exp / p f32 temporaries
    est += 3 * block_q * max(d_k, d_v, D) * 4    # misc per-head temporaries
    headroom = 4 * 1024 * 1024
    cap = min(int(0.8 * vmem_cap), 100 * 1024 * 1024)
    vmem_limit = int(max(min(est + headroom, cap), 16 * 1024 * 1024))

    return pl.pallas_call(
        kernel,
        out_shape=out_shapes,
        grid_spec=grid_spec,
        compiler_params=pltpu.CompilerParams(
            dimension_semantics=("parallel", "parallel", "arbitrary"),
            vmem_limit_bytes=vmem_limit),
    )(q, q_bf, kp, vp, wq3, wfc3, gamma, beta)


def _reference(q, k, v, params, *, n_head, d_k, d_v, eps=1e-6):
    """Pure-JAX f32 reference mirroring the PyTorch forward (dropout = identity)."""
    B, Lq, D = q.shape
    Lk = k.shape[1]
    residual = q
    qp = (q @ params["w_qs"]).reshape(B, Lq, n_head, d_k).transpose(0, 2, 1, 3)
    kp = (k @ params["w_ks"]).reshape(B, Lk, n_head, d_k).transpose(0, 2, 1, 3)
    vp = (v @ params["w_vs"]).reshape(B, Lk, n_head, d_v).transpose(0, 2, 1, 3)
    attn_orig = jnp.einsum("bhqd,bhkd->bhqk", qp / (d_k ** 0.5), kp)
    attn = jax.nn.softmax(attn_orig, axis=-1)
    out = jnp.einsum("bhqk,bhkd->bhqd", attn, vp)
    out = out.transpose(0, 2, 1, 3).reshape(B, Lq, n_head * d_v)
    out = out @ params["fc"] + residual
    mu = out.mean(-1, keepdims=True)
    var = ((out - mu) ** 2).mean(-1, keepdims=True)
    out = (out - mu) / jnp.sqrt(var + eps)
    out = out * params["ln_gamma"] + params["ln_beta"]
    return out, attn_orig, attn


if __name__ == "__main__":
    # Small shapes consistent with the module.
    B, L, d_model = 2, 8, 32
    n_head, d_k, d_v = 4, 8, 8

    key = jax.random.PRNGKey(0)
    kq, kk, kv, kwq, kwk, kwv, kwf = jax.random.split(key, 7)

    q = jax.random.normal(kq, (B, L, d_model), jnp.float32)
    k = jax.random.normal(kk, (B, L, d_model), jnp.float32)
    v = jax.random.normal(kv, (B, L, d_model), jnp.float32)

    scale = 1.0 / (d_model ** 0.5)
    params = {
        "w_qs": jax.random.normal(kwq, (d_model, n_head * d_k), jnp.float32) * scale,
        "w_ks": jax.random.normal(kwk, (d_model, n_head * d_k), jnp.float32) * scale,
        "w_vs": jax.random.normal(kwv, (d_model, n_head * d_v), jnp.float32) * scale,
        "fc":   jax.random.normal(kwf, (n_head * d_v, d_model), jnp.float32) * scale,
        # nn.LayerNorm default init: weight=1, bias=0.
        "ln_gamma": jnp.ones((1, d_model), jnp.float32),
        "ln_beta":  jnp.zeros((1, d_model), jnp.float32),
    }

    out, attn_orig, attn = multi_head_attention(
        q, k, v, params, n_head=n_head, d_k=d_k, d_v=d_v)
    jax.block_until_ready((out, attn_orig, attn))

    ref_out, ref_attn_orig, ref_attn = _reference(
        q, k, v, params, n_head=n_head, d_k=d_k, d_v=d_v)

    assert out.shape == (B, L, d_model)
    assert attn_orig.shape == (B, n_head, L, L)
    assert attn.shape == (B, n_head, L, L)
    # Kernel matmuls run in bf16 (f32 accumulation) and the attention maps are
    # stored in bf16; compare against the f32 reference with suitable tolerances.
    assert jnp.allclose(out, ref_out, atol=2e-2, rtol=2e-2)
    assert jnp.allclose(attn_orig.astype(jnp.float32), ref_attn_orig,
                        atol=3e-2, rtol=3e-2)
    assert jnp.allclose(attn.astype(jnp.float32), ref_attn,
                        atol=3e-2, rtol=3e-2)

    print("KERNEL_OK")
</pallas_src>

<mosaic_0001>
module attributes {stable_mosaic.version = 11 : i64} {
  func.func @_mha_kernel(%arg0: i32, %arg1: i32, %arg2: i32, %arg3: memref<1x8x32xf32, #tpu.memory_space<vmem>>, %arg4: memref<1x8x32xbf16, #tpu.memory_space<vmem>>, %arg5: memref<1x1x8x8xbf16, #tpu.memory_space<vmem>>, %arg6: memref<1x1x8x8xbf16, #tpu.memory_space<vmem>>, %arg7: memref<1x32x8xbf16, #tpu.memory_space<vmem>>, %arg8: memref<1x8x32xbf16, #tpu.memory_space<vmem>>, %arg9: memref<1x32xf32, #tpu.memory_space<vmem>>, %arg10: memref<1x32xf32, #tpu.memory_space<vmem>>, %arg11: memref<1x8x32xf32, #tpu.memory_space<vmem>>, %arg12: memref<1x1x8x8xbf16, #tpu.memory_space<vmem>>, %arg13: memref<1x1x8x8xbf16, #tpu.memory_space<vmem>>, %arg14: memref<8x32xf32, #tpu.memory_space<vmem>>) attributes {dimension_semantics = [#tpu.dimension_semantics<parallel>, #tpu.dimension_semantics<parallel>, #tpu.dimension_semantics<arbitrary>], iteration_bounds = array<i64: 2, 1, 4>, scalar_prefetch = 0 : i64, scratch_operands = 1 : i64, tpu.core_type = #tpu.core_type<tc>, window_params = [{transform_indices = @transform_0, window_bounds = array<i64: 1, 8, 32>}, {transform_indices = @transform_1, window_bounds = array<i64: 1, 8, 32>}, {transform_indices = @transform_2, window_bounds = array<i64: 1, 1, 8, 8>}, {transform_indices = @transform_3, window_bounds = array<i64: 1, 1, 8, 8>}, {transform_indices = @transform_4, window_bounds = array<i64: 1, 32, 8>}, {transform_indices = @transform_5, window_bounds = array<i64: 1, 8, 32>}, {pipeline_mode = #tpu.pipeline_mode<synchronous>, transform_indices = @transform_6, window_bounds = array<i64: 1, 32>}, {pipeline_mode = #tpu.pipeline_mode<synchronous>, transform_indices = @transform_7, window_bounds = array<i64: 1, 32>}, {transform_indices = @transform_8, window_bounds = array<i64: 1, 8, 32>}, {transform_indices = @transform_9, window_bounds = array<i64: 1, 1, 8, 8>}, {transform_indices = @transform_10, window_bounds = array<i64: 1, 1, 8, 8>}]} {
    %c0 = arith.constant 0 : index
    %c0_0 = arith.constant 0 : index
    %c0_1 = arith.constant 0 : index
    %0 = vector.load %arg4[%c0, %c0_0, %c0_1] : memref<1x8x32xbf16, #tpu.memory_space<vmem>>, vector<1x8x32xbf16>
    %1 = vector.shape_cast %0 : vector<1x8x32xbf16> to vector<8x32xbf16>
    %c0_2 = arith.constant 0 : index
    %c0_3 = arith.constant 0 : index
    %c0_4 = arith.constant 0 : index
    %2 = vector.load %arg7[%c0_2, %c0_3, %c0_4] : memref<1x32x8xbf16, #tpu.memory_space<vmem>>, vector<1x32x8xbf16>
    %3 = vector.shape_cast %2 : vector<1x32x8xbf16> to vector<32x8xbf16>
    %cst = arith.constant dense<0.000000e+00> : vector<8x8xf32>
    %4 = tpu.matmul %1, %3, %cst {dimension_numbers = #tpu.dot_dimension_numbers<[1], [0], [0], [1], [0, 0, 1, 1], [], []>} : vector<8x32xbf16>, vector<32x8xbf16>, vector<8x8xf32> -> vector<8x8xf32>
    %c0_5 = arith.constant 0 : index
    %c0_6 = arith.constant 0 : index
    %c0_7 = arith.constant 0 : index
    %c0_8 = arith.constant 0 : index
    %5 = vector.load %arg5[%c0_5, %c0_6, %c0_7, %c0_8] : memref<1x1x8x8xbf16, #tpu.memory_space<vmem>>, vector<1x1x8x8xbf16>
    %6 = vector.shape_cast %5 : vector<1x1x8x8xbf16> to vector<8x8xbf16>
    %c0_9 = arith.constant 0 : index
    %c0_10 = arith.constant 0 : index
    %c0_11 = arith.constant 0 : index
    %c0_12 = arith.constant 0 : index
    %7 = vector.load %arg6[%c0_9, %c0_10, %c0_11, %c0_12] : memref<1x1x8x8xbf16, #tpu.memory_space<vmem>>, vector<1x1x8x8xbf16>
    %8 = vector.shape_cast %7 : vector<1x1x8x8xbf16> to vector<8x8xbf16>
    %9 = arith.truncf %4 : vector<8x8xf32> to vector<8x8xbf16>
    %cst_13 = arith.constant dense<0.000000e+00> : vector<8x8xf32>
    %10 = tpu.matmul %9, %6, %cst_13 {dimension_numbers = #tpu.dot_dimension_numbers<[1], [1], [0], [0], [0, 0, 1, 0], [], []>} : vector<8x8xbf16>, vector<8x8xbf16>, vector<8x8xf32> -> vector<8x8xf32>
    %11 = arith.truncf %10 : vector<8x8xf32> to vector<8x8xbf16>
    %c0_14 = arith.constant 0 : index
    %c0_15 = arith.constant 0 : index
    %c0_16 = arith.constant 0 : index
    %c0_17 = arith.constant 0 : index
    %12 = vector.load %arg12[%c0_14, %c0_15, %c0_16, %c0_17] : memref<1x1x8x8xbf16, #tpu.memory_space<vmem>>, vector<1x1x8x8xbf16>
    %13 = vector.shape_cast %12 : vector<1x1x8x8xbf16> to vector<8x8xbf16>
    %14 = vector.shape_cast %11 : vector<8x8xbf16> to vector<1x1x8x8xbf16>
    tpu.vector_store %arg12[%c0_14, %c0_15, %c0_16, %c0_17], %14 {strides = array<i32>} : memref<1x1x8x8xbf16, #tpu.memory_space<vmem>>, vector<1x1x8x8xbf16>,
    %cst_18 = arith.constant dense<0xFF800000> : vector<8xf32>
    %15 = vector.multi_reduction <maximumf>, %10, %cst_18 [1] : vector<8x8xf32> to vector<8xf32>
    %16 = vector.shape_cast %15 : vector<8xf32> to vector<8x1xf32>
    %17 = vector.broadcast %16 : vector<8x1xf32> to vector<8x8xf32>
    %18 = arith.subf %10, %17 : vector<8x8xf32>
    %19 = math.exp %18 : vector<8x8xf32>
    %cst_19 = arith.constant dense<0.000000e+00> : vector<8xf32>
    %20 = vector.multi_reduction <add>, %19, %cst_19 [1] : vector<8x8xf32> to vector<8xf32>
    %21 = vector.shape_cast %20 : vector<8xf32> to vector<8x1xf32>
    %22 = tpu.reciprocal %21 {approx = true} : vector<8x1xf32> -> vector<8x1xf32>
    %23 = vector.broadcast %22 : vector<8x1xf32> to vector<8x8xf32>
    %24 = arith.mulf %19, %23 : vector<8x8xf32>
    %25 = arith.truncf %24 : vector<8x8xf32> to vector<8x8xbf16>
    %c0_20 = arith.constant 0 : index
    %c0_21 = arith.constant 0 : index
    %c0_22 = arith.constant 0 : index
    %c0_23 = arith.constant 0 : index
    %26 = vector.load %arg13[%c0_20, %c0_21, %c0_22, %c0_23] : memref<1x1x8x8xbf16, #tpu.memory_space<vmem>>, vector<1x1x8x8xbf16>
    %27 = vector.shape_cast %26 : vector<1x1x8x8xbf16> to vector<8x8xbf16>
    %28 = vector.shape_cast %25 : vector<8x8xbf16> to vector<1x1x8x8xbf16>
    tpu.vector_store %arg13[%c0_20, %c0_21, %c0_22, %c0_23], %28 {strides = array<i32>} : memref<1x1x8x8xbf16, #tpu.memory_space<vmem>>, vector<1x1x8x8xbf16>,
    %29 = arith.truncf %24 : vector<8x8xf32> to vector<8x8xbf16>
    %cst_24 = arith.constant dense<0.000000e+00> : vector<8x8xf32>
    %30 = tpu.matmul %29, %8, %cst_24 {dimension_numbers = #tpu.dot_dimension_numbers<[1], [0], [0], [1], [0, 0, 1, 1], [], []>} : vector<8x8xbf16>, vector<8x8xbf16>, vector<8x8xf32> -> vector<8x8xf32>
    %31 = arith.truncf %30 : vector<8x8xf32> to vector<8x8xbf16>
    %c0_25 = arith.constant 0 : index
    %c0_26 = arith.constant 0 : index
    %c0_27 = arith.constant 0 : index
    %32 = vector.load %arg8[%c0_25, %c0_26, %c0_27] : memref<1x8x32xbf16, #tpu.memory_space<vmem>>, vector<1x8x32xbf16>
    %33 = vector.shape_cast %32 : vector<1x8x32xbf16> to vector<8x32xbf16>
    %cst_28 = arith.constant dense<0.000000e+00> : vector<8x32xf32>
    %34 = tpu.matmul %31, %33, %cst_28 {dimension_numbers = #tpu.dot_dimension_numbers<[1], [0], [0], [1], [0, 0, 1, 1], [], []>} : vector<8x8xbf16>, vector<8x32xbf16>, vector<8x32xf32> -> vector<8x32xf32>
    %c0_i32 = arith.constant 0 : i32
    %35 = arith.cmpi eq, %arg2, %c0_i32 : i32
    %36 = arith.extui %35 : i1 to i32
    %c0_i32_29 = arith.constant 0 : i32
    %37 = arith.cmpi ne, %36, %c0_i32_29 : i32
    scf.if %37 {
      %cst_35 = arith.constant 0.000000e+00 : f32
      %44 = vector.broadcast %cst_35 : f32 to vector<8x32xf32>
      %c0_36 = arith.constant 0 : index
      %c0_37 = arith.constant 0 : index
      %45 = vector.load %arg14[%c0_36, %c0_37] : memref<8x32xf32, #tpu.memory_space<vmem>>, vector<8x32xf32>
      tpu.vector_store %arg14[%c0_36, %c0_37], %44 {strides = array<i32>} : memref<8x32xf32, #tpu.memory_space<vmem>>, vector<8x32xf32>,
    } else {
    }
    %c0_30 = arith.constant 0 : index
    %c0_31 = arith.constant 0 : index
    %38 = vector.load %arg14[%c0_30, %c0_31] : memref<8x32xf32, #tpu.memory_space<vmem>>, vector<8x32xf32>
    %39 = arith.addf %38, %34 : vector<8x32xf32>
    %c0_32 = arith.constant 0 : index
    %c0_33 = arith.constant 0 : index
    %40 = vector.load %arg14[%c0_32, %c0_33] : memref<8x32xf32, #tpu.memory_space<vmem>>, vector<8x32xf32>
    tpu.vector_store %arg14[%c0_32, %c0_33], %39 {strides = array<i32>} : memref<8x32xf32, #tpu.memory_space<vmem>>, vector<8x32xf32>,
    %c3_i32 = arith.constant 3 : i32
    %41 = arith.cmpi eq, %arg2, %c3_i32 : i32
    %42 = arith.extui %41 : i1 to i32
    %c0_i32_34 = arith.constant 0 : i32
    %43 = arith.cmpi ne, %42, %c0_i32_34 : i32
    scf.if %43 {
      %c0_35 = arith.constant 0 : index
      %c0_36 = arith.constant 0 : index
      %44 = vector.load %arg14[%c0_35, %c0_36] : memref<8x32xf32, #tpu.memory_space<vmem>>, vector<8x32xf32>
      %c0_37 = arith.constant 0 : index
      %c0_38 = arith.constant 0 : index
      %c0_39 = arith.constant 0 : index
      %45 = vector.load %arg3[%c0_37, %c0_38, %c0_39] : memref<1x8x32xf32, #tpu.memory_space<vmem>>, vector<1x8x32xf32>
      %46 = vector.shape_cast %45 : vector<1x8x32xf32> to vector<8x32xf32>
      %47 = arith.addf %44, %46 : vector<8x32xf32>
      %cst_40 = arith.constant dense<0.000000e+00> : vector<8xf32>
      %48 = vector.multi_reduction <add>, %47, %cst_40 [1] : vector<8x32xf32> to vector<8xf32>
      %49 = vector.shape_cast %48 : vector<8xf32> to vector<8x1xf32>
      %cst_41 = arith.constant 3.200000e+01 : f32
      %50 = vector.broadcast %cst_41 : f32 to vector<8x1xf32>
      %51 = arith.divf %49, %50 : vector<8x1xf32>
      %52 = vector.broadcast %51 : vector<8x1xf32> to vector<8x32xf32>
      %53 = arith.subf %47, %52 : vector<8x32xf32>
      %54 = arith.mulf %53, %53 : vector<8x32xf32>
      %cst_42 = arith.constant dense<0.000000e+00> : vector<8xf32>
      %55 = vector.multi_reduction <add>, %54, %cst_42 [1] : vector<8x32xf32> to vector<8xf32>
      %56 = vector.shape_cast %55 : vector<8xf32> to vector<8x1xf32>
      %cst_43 = arith.constant 3.200000e+01 : f32
      %57 = vector.broadcast %cst_43 : f32 to vector<8x1xf32>
      %58 = arith.divf %56, %57 : vector<8x1xf32>
      %59 = vector.broadcast %51 : vector<8x1xf32> to vector<8x32xf32>
      %60 = arith.subf %47, %59 : vector<8x32xf32>
      %cst_44 = arith.constant 9.99999997E-7 : f32
      %61 = vector.broadcast %cst_44 : f32 to vector<8x1xf32>
      %62 = arith.addf %58, %61 : vector<8x1xf32>
      %63 = math.rsqrt %62 : vector<8x1xf32>
      %64 = vector.broadcast %63 : vector<8x1xf32> to vector<8x32xf32>
      %65 = arith.mulf %60, %64 : vector<8x32xf32>
      %c0_45 = arith.constant 0 : index
      %c0_46 = arith.constant 0 : index
      %66 = vector.load %arg9[%c0_45, %c0_46] : memref<1x32xf32, #tpu.memory_space<vmem>>, vector<1x32xf32>
      %67 = vector.broadcast %66 : vector<1x32xf32> to vector<8x32xf32>
      %68 = arith.mulf %65, %67 : vector<8x32xf32>
      %c0_47 = arith.constant 0 : index
      %c0_48 = arith.constant 0 : index
      %69 = vector.load %arg10[%c0_47, %c0_48] : memref<1x32xf32, #tpu.memory_space<vmem>>, vector<1x32xf32>
      %70 = vector.broadcast %69 : vector<1x32xf32> to vector<8x32xf32>
      %71 = arith.addf %68, %70 : vector<8x32xf32>
      %c0_49 = arith.constant 0 : index
      %c0_50 = arith.constant 0 : index
      %c0_51 = arith.constant 0 : index
      %72 = vector.load %arg11[%c0_49, %c0_50, %c0_51] : memref<1x8x32xf32, #tpu.memory_space<vmem>>, vector<1x8x32xf32>
      %73 = vector.shape_cast %72 : vector<1x8x32xf32> to vector<8x32xf32>
      %74 = vector.shape_cast %71 : vector<8x32xf32> to vector<1x8x32xf32>
      tpu.vector_store %arg11[%c0_49, %c0_50, %c0_51], %74 {strides = array<i32>} : memref<1x8x32xf32, #tpu.memory_space<vmem>>, vector<1x8x32xf32>,
    } else {
    }
    return
  }
  func.func @transform_0(%arg0: i32, %arg1: i32, %arg2: i32) -> (i32, i32, i32) {
    %c0_i32 = arith.constant 0 : i32
    %c0_i32_0 = arith.constant 0 : i32
    return %arg0, %arg1, %c0_i32 : i32, i32, i32
  }
  func.func @transform_1(%arg0: i32, %arg1: i32, %arg2: i32) -> (i32, i32, i32) {
    %c0_i32 = arith.constant 0 : i32
    %c0_i32_0 = arith.constant 0 : i32
    return %arg0, %arg1, %c0_i32 : i32, i32, i32
  }
  func.func @transform_2(%arg0: i32, %arg1: i32, %arg2: i32) -> (i32, i32, i32, i32) {
    %c0_i32 = arith.constant 0 : i32
    %c0_i32_0 = arith.constant 0 : i32
    %c0_i32_1 = arith.constant 0 : i32
    return %arg0, %arg2, %c0_i32, %c0_i32_0 : i32, i32, i32, i32
  }
  func.func @transform_3(%arg0: i32, %arg1: i32, %arg2: i32) -> (i32, i32, i32, i32) {
    %c0_i32 = arith.constant 0 : i32
    %c0_i32_0 = arith.constant 0 : i32
    %c0_i32_1 = arith.constant 0 : i32
    return %arg0, %arg2, %c0_i32, %c0_i32_0 : i32, i32, i32, i32
  }
  func.func @transform_4(%arg0: i32, %arg1: i32, %arg2: i32) -> (i32, i32, i32) {
    %c0_i32 = arith.constant 0 : i32
    %c0_i32_0 = arith.constant 0 : i32
    %c0_i32_1 = arith.constant 0 : i32
    return %arg2, %c0_i32, %c0_i32_0 : i32, i32, i32
  }
  func.func @transform_5(%arg0: i32, %arg1: i32, %arg2: i32) -> (i32, i32, i32) {
    %c0_i32 = arith.constant 0 : i32
    %c0_i32_0 = arith.constant 0 : i32
    %c0_i32_1 = arith.constant 0 : i32
    return %arg2, %c0_i32, %c0_i32_0 : i32, i32, i32
  }
  func.func @transform_6(%arg0: i32, %arg1: i32, %arg2: i32) -> (i32, i32) {
    %c0_i32 = arith.constant 0 : i32
    %c0_i32_0 = arith.constant 0 : i32
    %c0_i32_1 = arith.constant 0 : i32
    return %c0_i32, %c0_i32_0 : i32, i32
  }
  func.func @transform_7(%arg0: i32, %arg1: i32, %arg2: i32) -> (i32, i32) {
    %c0_i32 = arith.constant 0 : i32
    %c0_i32_0 = arith.constant 0 : i32
    %c0_i32_1 = arith.constant 0 : i32
    return %c0_i32, %c0_i32_0 : i32, i32
  }
  func.func @transform_8(%arg0: i32, %arg1: i32, %arg2: i32) -> (i32, i32, i32) {
    %c0_i32 = arith.constant 0 : i32
    %c0_i32_0 = arith.constant 0 : i32
    return %arg0, %arg1, %c0_i32 : i32, i32, i32
  }
  func.func @transform_9(%arg0: i32, %arg1: i32, %arg2: i32) -> (i32, i32, i32, i32) {
    %c0_i32 = arith.constant 0 : i32
    %c0_i32_0 = arith.constant 0 : i32
    return %arg0, %arg2, %arg1, %c0_i32 : i32, i32, i32, i32
  }
  func.func @transform_10(%arg0: i32, %arg1: i32, %arg2: i32) -> (i32, i32, i32, i32) {
    %c0_i32 = arith.constant 0 : i32
    %c0_i32_0 = arith.constant 0 : i32
    return %arg0, %arg2, %arg1, %c0_i32 : i32, i32, i32, i32
  }
}

</mosaic_0001>

<bundles_post_ra>
// kernel: tpu_custom_call.1
= control target key start
LH: loop header
LB: loop body
LE: loop exit
PB: predicated region body
PF: predicated region fallthrough
CT: control target
= control target key end

     0   :  { %s1975_s0 = inlined_call_operand.vmem [shape: f32[2,8,32], index: 0, kind: input, shape index: {}]   ;;  %s1976_s1 = inlined_call_operand.hbm [shape: bf16[2,8,32], index: 1, kind: input, shape index: {}]   ;;  %s1977_s2 = inlined_call_operand.vmem [shape: bf16[2,4,8,8], index: 2, kind: input, shape index: {}]   ;;  %s1978_s3 = inlined_call_operand.vmem [shape: bf16[2,4,8,8], index: 3, kind: input, shape index: {}]   ;;  %s1979_s4 = inlined_call_operand.vmem [shape: bf16[4,32,8], index: 4, kind: input, shape index: {}]   ;;  %s1980_s5 = inlined_call_operand.vmem [shape: bf16[4,8,32], index: 5, kind: input, shape index: {}]   ;;  %s1981_s6 = inlined_call_operand.vmem [shape: f32[1,32], index: 6, kind: input, shape index: {}]   ;;  %s1982_s7 = inlined_call_operand.vmem [shape: f32[1,32], index: 7, kind: input, shape index: {}]   ;;  %s1983_s8 = inlined_call_operand.hbm [shape: f32[2,8,32], index: 8, kind: output, shape index: {0}]   ;;  %s1984_s9 = inlined_call_operand.hbm [shape: bf16[2,4,8,8], index: 9, kind: output, shape index: {1}]   ;;  %s1985_s10 = inlined_call_operand.hbm [shape: bf16[2,4,8,8], index: 10, kind: output, shape index: {2}]  }
   0x1   :  { %2002 = sst [smem:[#allocation22_spill]] %s1975_s0 }
   0x2   :  { %2003 = sst [smem:[#allocation23_spill]] %s1976_s1 }
   0x3   :  { %2004 = sst [smem:[#allocation24_spill]] %s1977_s2 }
   0x4   :  { %2005 = sst [smem:[#allocation25_spill]] %s1978_s3 }
   0x5   :  { %2006 = sst [smem:[#allocation26_spill]] %s1979_s4 }
   0x6   :  { %2007 = sst [smem:[#allocation27_spill]] %s1980_s5 }
   0x7   :  { %2008 = sst [smem:[#allocation28_spill]] %s1982_s7 }
   0x8   :  { %2009 = sst [smem:[#allocation29_spill]] %s1983_s8 }
   0x9   :  { %2010 = sst [smem:[#allocation30_spill]] %s1984_s9 }
   0xa   :  { %2011 = sst [smem:[#allocation31_spill]] %s1985_s10 }
   0xb   :  { %16 = vsyncpa [#allocation4], 0 }
   0xc   :  { %18 = vsyncpa [#allocation4 + $0x1], 0 }
   0xd   :  { %19 = vsyncpa [#allocation5], 0 }
   0xe   :  { %21 = vsyncpa [#allocation5 + $0x1], 0 }
   0xf   :  { %22 = vsyncpa [#allocation8], 0 }
  0x10   :  { %24 = vsyncpa [#allocation8 + $0x1], 0  ;;  %s1580_s13 = smov 0   ;;  %s1582_s14 = smov 0  }
  0x11   :  { %s1584_s15 = smov 0   ;;  %s1586_s16 = smov 0  }
  0x12   :  { %s1588_s17 = smov 0   ;;  %s1590_s18 = smov 0  }
  0x13   :  { %s1592_s19 = smov 0   ;;  %s1594_s20 = smov 0  }
  0x14   :  { %s1596_s21 = smov 0   ;;  %s1598_s22 = smov 0  }
  0x15   :  { %s1600_s23 = smov 0  }
  0x16 LB: > { %2012 = sst [smem:[#allocation13_spill]] %s1488_s16  ;;  %s1636_s24 = sadd.s32 4294967295, %s1516_s23   ;;  %s1516_s23 = sphi %s1600_s23, %s30_s23   ;;  %s1512_s22 = sphi %s1598_s22, %s2057_s22   ;;  %s1508_s21 = sphi %s1596_s21, %s2056_s21   ;;  %s1504_s20 = sphi %s1594_s20, %s2055_s20   ;;  %s1500_s19 = sphi %s1592_s19, %s2054_s19   ;;  %s1496_s18 = sphi %s1590_s18, %s2053_s18   ;;  %s1492_s17 = sphi %s1588_s17, %s2052_s17   ;;  %s1488_s16 = sphi %s1586_s16, %s2051_s16   ;;  %s1484_s15 = sphi %s1584_s15, %s2060_s15   ;;  %s1480_s14 = sphi %s1582_s14, %s2059_s14   ;;  %s1476_s13 = sphi %s1580_s13, %s2058_s13  }
  0x17   : > { %2013 = sst [smem:[#allocation14_spill]] %s1492_s17  ;;  %s1986_s25 = sadd.s32 4294967294, %s1516_s23  }
  0x18   : > { %2014 = sst [smem:[#allocation15_spill]] %s1496_s18  ;;  %s42_s26 = sadd.s32 1, %s1508_s21 }
  0x19   : > { %2015 = sst [smem:[#allocation16_spill]] %s1508_s21  ;;  %s49_s27 = sadd.s32 1, %s1512_s22 }
  0x1a   : > { %2016 = sst [smem:[#allocation17_spill]] %s1512_s22  ;;  %p43_p0 = scmp.ge.s32.totalorder %s42_s26, 4 }
  0x1b   : > { %s86_s28 = sadd.s32 1, %s1496_s18  ;;  %p93_p1 = scmp.ne.s32.totalorder %s1496_s18, %s1492_s17 }
  0x1c   : > { %p94_p2 = scmp.eq.s32.totalorder %s1516_s23, 0  ;;  %s2062_s26 = smov (%p43_p0, %s42_s26), 0 }
  0x1d   : > { %2017 = sst [smem:[#allocation18_spill]] %s2062_s26  ;;  %s2064_s27 = smov (!%p43_p0, %s49_s27), %s1512_s22 }
  0x1e   : > { %p1648_p3 = por %p94_p2, %p93_p1  ;;  %p99_p4 = scmp.ne.s32.totalorder %s1492_s17, %s1488_s16 }
  0x1f   : > { %p51_p5 = scmp.ge.s32.totalorder %s2064_s27, 2  ;;  %p100_p6 = scmp.eq.s32.totalorder %s1636_s24, 0 }
  0x20   : > { %p275_p7 = scmp.eq.s32.totalorder %s1636_s24, 7  ;;  %p1658_p8 = scmp.eq.s32.totalorder %s1986_s25, 7 }
  0x21   : > { %s2066_s27 = smov (%p51_p5, %s2064_s27), 0  ;;  %p1664_p9 = por %p100_p6, %p99_p4 }
  0x22   : > { %2020 = sst [smem:[#allocation19_spill]] %s2066_s27  ;;  %p1670_p10 = por %p275_p7, %p93_p1 }
  0x23   : > { %s81_s25 = ssub.s32 %s1512_s22, %s2066_s27  ;;  %p1678_p11 = por %p1658_p8, %p99_p4 }
  0x24   : > { %s2022_s12 = scalar_select %p1670_p10, 1, 0 }
  0x25   : > { %s2024_s16 = scalar_select %p1678_p11, 1, 0 }
  0x26   : > { %2023 = sst [smem:[#allocation20_spill]] %s2022_s12  ;;  %p84_p12 = scmp.eq.s32.totalorder %s81_s25, 0 }
  0x27   : > { %s288_s10 = ssub.s32 %s1508_s21, %s2062_s26  ;;  %s294_s9 = sadd.s32 1, %s1484_s15 }
  0x28   : > { %s289_s8 = sor.u32 %s288_s10, %s81_s25  ;;  %p304_p0 = scmp.ne.s32.totalorder %s1484_s15, %s1480_s14 }
  0x29   : > { %s1686_s7 = scalar_select %p84_p12, %s1496_s18, %s86_s28  }
  0x2a   : > { %p292_p13 = scmp.eq.s32.totalorder %s289_s8, 0  ;;  %p310_p1 = scmp.ne.s32.totalorder %s1480_s14, %s1476_s13 }
  0x2b   : > { %2025 = sst [smem:[#allocation21_spill]] %s1686_s7  ;;  %p1697_p2 = por %p304_p0, %p275_p7 }
  0x2c   : > { %s1693_s12 = scalar_select %p292_p13, %s1484_s15, %s294_s9  }
  0x2d   : > { %s2026_s27 = scalar_select %p1697_p2, 1, 0 }
  0x2e   : > { %p1703_p4 = por %p310_p1, %p1658_p8  ;;  %p1203_p5 = scmp.lt.s32.totalorder %s1516_s23, 8 }
  0x2f   : > { %s377_s10 = sand.u32 1, %s1496_s18   ;;  %s1111_s28 = sshll.u32 %s1512_s22, 6 }
  0x30   : > { %s2027_s26 = scalar_select %p1703_p4, 1, 0 }
  0x31   : > { %s1110_s25 = sshll.u32 %s377_s10, 2  ;;  %s2028_s1 = sld [smem:[#allocation23_spill]] }
  0x32   : > { %s381_s9 = scalar_lea.vmem [#allocation3], %s1110_s25  ;;  %p1719_p6 = pnand %p1203_p5, %p1648_p3 }
  0x33   : > { %s389_s7 = sshll.u32 %s381_s9, 4  ;;  %s378_s21 = scalar_lea.sflag [#allocation4], %s377_s10  ;;  %s1715_s7 = int_to_ptr.vmem [resolvable:$true] %s389_s7 }
  0x34   : > { %p1306_p13 = pneg %p1719_p6 }
  0x37   : > { %s1713_s13 = scalar_lea.hbm %s2028_s1, %s1111_s28  ;;  %s1309_s29 = scalar_lea.hbm %s2028_s1, 128 }
  0x38   : > { %s1304_s28 = scalar_lea.hbm %s1713_s13, 64  ;;  %p1310_p3 = scmp.lt.u32.totalorder %s1713_s13, %s2028_s1 }
  0x39   : > { %p1305_p12 = scmp.ne.s32.totalorder %s1713_s13, %s1304_s28  ;;  %p1311_p5 = scmp.lt.u32.totalorder %s1309_s29, %s1304_s28 }
  0x3a   : > { %p1313_p8 = scmp.lt.u32.totalorder %s1304_s28, %s1713_s13 }
  0x3b   : > { %p1307_p0 = pnand %p1306_p13, %p1305_p12  ;;  %p1312_p7 = por %p1311_p5, %p1310_p3 }
  0x3d   : > { %p1308_p1 = pneg %p1307_p0  ;;  %p1314_p4 = por %p1313_p8, %p1312_p7 }
  0x3f   : > { %p1315_p11 = pnand %p1314_p4, %p1308_p1 }
  0x41   : > { %1318 = shalt.err (!%p1315_p11)
}
  0x42   : > { %s1319_s10 = scalar_lea.vmem %s1715_s7, 64  ;;  %s1518_s25 = smov [#allocation3]  }
  0x43   : > { %p1320_p12 = scmp.ne.s32.totalorder %s1715_s7, %s1319_s10  ;;  %s1324_s8 = sshll.u32 %s1518_s25, 4  ;;  %s1325_s8 = int_to_ptr.vmem [resolvable:$false] %s1324_s8 }
  0x44   : > { %s1326_s22 = scalar_lea.vmem %s1325_s8, 128  ;;  %p1327_p2 = scmp.lt.s32.totalorder %s1715_s7, %s1325_s8 }
  0x45   : > { %p1322_p0 = pnand %p1320_p12, %p1306_p13  ;;  %p1328_p3 = scmp.lt.s32.totalorder %s1326_s22, %s1319_s10 }
  0x47   : > { %p1323_p10 = pneg %p1322_p0  ;;  %p1329_p5 = por %p1328_p3, %p1327_p2 }
  0x49   : > { %p1330_p7 = pnand %p1329_p5, %p1323_p10 }
  0x4b   : > { %1333 = shalt.err (!%p1330_p7)
}
  0x4c   : > { %1192 = dma.hbm_to_vmem [thread:$0]  (!%p1719_p6), %s1713_s13, 64, %s1715_s7, %s378_s21  }
  0x4d   : > { %p2030_p11 = scmp.lt.s32.totalorder %s1516_s23, 9  ;;  %p2031_p4 = scmp.ge.s32.totalorder %s1516_s23, 1 }
  0x4f   : > { %p432_p8 = pnand %p2031_p4, %p2030_p11 }
  0x50   : > { %s1755_s28 = sand.u32 (!%p432_p8), 1, %s1492_s17  }
  0x51   : > { %435 = sbr.rel (%p432_p8) target bundleno = 1682 (0x692), region = 52  ;;  %s1113_s29 = sshll.u32 (!%p432_p8), %s1755_s28, 2 }
  0x52   : > { %s438_s9 = scalar_lea.sflag (!%p432_p8), [#allocation4], %s1755_s28  ;;  %s1759_s10 = scalar_lea.vmem (!%p432_p8), [#allocation3], %s1113_s29 }
  0x58   : > { %1463 = dma.done.wait (%p1664_p9), %s438_s9, 64  }
  0x59   : > { %1465 = vsyncadd (%p1664_p9), %s438_s9, 4294967232  ;;  %p529_p10 = scmp.lt.s32.totalorder %s1500_s19, 3  ;;  %v1519_v0 = vmov 0.0   ;;  %vm1520_vm0 = vmmov 0   ;;  %p520_p2 = scmp.lt.s32.totalorder %s1504_s20, 1  ;;  %vm617_vm1 = vcmask 64512  }
  0x5a   : > { %1155 = vmatprep.subr.bf16.mxu0 %v1519_v0  ;;  %1159 = vmatprep.mubr.msk.bf16.mxu0 %vm1520_vm0, %v1519_v0  ;;  %s2032_s4 = sld [smem:[#allocation26_spill]]  ;;  %s2033_s0 = sld [smem:[#allocation22_spill]]  ;;  %v553_v5 = vld [vmem:[%s1759_s10] sm:$0xf]  ;;  %vm570_vm2 = vcmask 261120   ;;  %vm665_vm3 = vcmask 60416  }
  0x5b   : > { %s1770_s13 = scalar_select %p529_p10, %s1500_s19, 3  ;;  %1163 = vmatprep.subr.bf16.mxu1 %v1519_v0  ;;  %1165 = vmatprep.mubr.msk.bf16.mxu1 %vm1520_vm0, %v1519_v0  ;;  %vm683_vm4 = vcmask 1043456  }
  0x5c   : > { %s521_s11 = scalar_select %p520_p2, %s1504_s20, 1 }
  0x5d   : > { %s1145_s30 = sshll.u32 %s1770_s13, 4  ;;  %s2034_s2 = sld [smem:[#allocation24_spill]] }
  0x5e   : > { %s1117_s22 = sshll.u32 %s521_s11, 3  ;;  %s1118_s1 = sshll.u32 %s521_s11, 2 }
  0x5f   : > { %s1784_s18 = sadd.s32 %s1118_s1, %s1770_s13  ;;  %s510_s1 = sand.u32 1, %s1480_s14  }
  0x60   : > { %s547_s8 = scalar_lea.vmem %s2032_s4, %s1145_s30  ;;  %s1781_s7 = scalar_lea.vmem %s2033_s0, %s1117_s22 }
  0x61   : > { %v1296_v1 = vld [vmem:[%s547_s8] sm:$0xff]   ;;  %s1119_s17 = sshll.u32 %s1784_s18, 2  ;;  %v1297_v2 = vld [vmem:[%s547_s8 + $0x8] sm:$0xff]   ;;  %s1799_s11 = sshll.u32 %s510_s1, 2 }
  0x62   : > { %1156 = vmatpush3.bf16.msra.mxu0 %v1296_v1  ;;  %s512_s10 = scalar_lea.vmem [#allocation7], %s1799_s11  ;;  %s2035_s3 = sld [smem:[#allocation25_spill]] }
  0x63   : > { %s534_s25 = scalar_lea.vmem %s2034_s2, %s1119_s17  ;;  %1157 = vmatprep.subr.bf16.mxu0 %v1519_v0  ;;  %s1124_s9 = sshll.u32 %s1770_s13, 2 }
  0x64   : > { %v614_v3 = vld [vmem:[%s534_s25] sm:$0xf]  ;;  %s2036_s5 = sld [smem:[#allocation27_spill]]  ;;  %s2037_s18 = sshll.u32 %s1755_s28, 3 }
  0x65   : > { %v622_v4 = vsel %vm617_vm1, %v614_v3, 0  ;;  %s1824_s13 = scalar_lea.vmem [#allocation6], %s2037_s18  ;;  %p1131_p9 = scmp.ne.s32.totalorder %s1500_s19, 0 }
  0x66   : > { %1164 = vmatpush3.bf16.xpose.msra.mxu1 %v622_v4  ;;  %1158 = vmatpush3.bf16.msra.mxu0 %v1297_v2  ;;  %v1521_v39 = vmov (!%p1131_p9), 0.0  }
  0x67   : > { %1175 = vmatprep.subr.bf16.mxu1 %v1519_v0  ;;  %1169 = vmatprep.subr.bf16.mxu0 %v1519_v0  ;;  %779 = vst.msk [vmem:[#allocation2] sm:$0xff] (!%p1131_p9), %vm570_vm2, %v1521_v39 }
  0x68   : > { %s542_s29 = scalar_lea.vmem %s2035_s3, %s1119_s17  ;;  %s2001_s17 = scalar_lea.vmem [#allocation9], %s1799_s11 }
  0x69   : > { %1160 = vmatmul.mubr.msk.bf16.vlgmr.msra.gmra.mrb[0].mxu0 %vm570_vm2, %v553_v5  ;;  %v615_v22 = vld [vmem:[%s542_s29] sm:$0xf] }
  0x6a   : > { %1171 = vmatprep.mubr.msk.bf16.mxu0 %vm1520_vm0, %v1519_v0  ;;  %v685_v23 = vsel %vm683_vm4, %v615_v22, 0  ;;  %s551_s25 = scalar_lea.vmem %s2036_s5, %s1124_s9 }
  0x6b   : > { %1170 = vmatpush3.bf16.msra.mxu0 %v685_v23  ;;  %v728_v24 = vld [vmem:[%s551_s25] sm:$0xf] }
  0x6c   : > { %v733_v25 = vsel %vm683_vm4, %v728_v24, 0 }
 0x13c   : > { %v608_v6 = vpop.f32.mrb[0].mxu0 }
 0x13d   : > { %v616_v7 = vpack.c.bf16 %v608_v6, %v608_v6  ;;  %v1161_v8 = vpop.f32.mrb[1].mxu0 }
 0x13e   : > { %v611_v9 = vpop.f32.mrb[2].mxu0 }
 0x13f   : > { %v1162_v10 = vpop.f32.mrb[3].mxu0  ;;  %1166 = vmatmul.mubr.msk.bf16.vlgmr.msra.gmra.mrb[0].mxu1 %vm617_vm1, %v616_v7 }
 0x140   : > { %1177 = vmatprep.mubr.msk.bf16.mxu1 %vm1520_vm0, %v1519_v0  ;;  %1176 = vmatpush3.bf16.msra.mxu1 %v733_v25 }
 0x212   : > { %v658_v11 = vpop.f32.mrb[0].mxu1 }
 0x213   : > { %v664_v12 = vpack.c.bf16 %v658_v11, %v658_v11  ;;  %v1167_v13 = vpop.f32.mrb[1].mxu1  ;;  %v667_v14 = vsel %vm617_vm1, %v658_v11, -inf }
 0x214   : > { %668 = vmax.xlane.f32.xlu0 %v667_v14  ;;  %v661_v15 = vpop.f32.mrb[2].mxu1 }
 0x215   : > { %666 = vst.msk [vmem:[%s512_s10] sm:$0xf] %vm665_vm3, %v664_v12  ;;  %v1168_v16 = vpop.f32.mrb[3].mxu1 }
 0x2a1   : > { %v669_v17 = vpop.xlane.xlu0 %668 }
 0x2a2   : > { %v670_v18 = vsub.f32 %v658_v11, %v669_v17 }
 0x2a4   : > { %v671_v19 = vmul.f32 1.442695, %v670_v18 }
 0x2a6   : > { %1298 = vpow2.f32 %v671_v19 }
 0x2b0   : > { %v1299_v20 = vpop.eup %1298 }
 0x2b1   : > { %v673_v21 = vsel %vm617_vm1, %v1299_v20, 0.0 }
 0x2b2   : > { %674 = vadd.xlane.f32.xlu0 %v673_v21 }
 0x33f   : > { %v675_v26 = vpop.xlane.xlu0 %674 }
 0x340   : > { %1300 = vrcp.f32 %v675_v26 }
 0x34a   : > { %v1301_v27 = vpop.eup %1300 }
 0x34b   : > { %v677_v28 = vmul.f32 %v1301_v27, %v1299_v20 }
 0x34d   : > { %v678_v29 = vpack.c.bf16 %v677_v28, %v677_v28 }
 0x34f   : > { %679 = vst.msk [vmem:[%s2001_s17] sm:$0xf] %vm665_vm3, %v678_v29  ;;  %1172 = vmatmul.mubr.msk.bf16.vlgmr.msra.gmra.mrb[4].mxu0 %vm617_vm1, %v678_v29 }
 0x422   : > { %v721_v30 = vpop.f32.mrb[4].mxu0 }
 0x423   : > { %v727_v31 = vpack.c.bf16 %v721_v30, %v721_v30  ;;  %v1173_v32 = vpop.f32.mrb[5].mxu0 }
 0x424   : > { %v724_v33 = vpop.f32.mrb[6].mxu0 }
 0x425   : > { %v1174_v34 = vpop.f32.mrb[7].mxu0  ;;  %1178 = vmatmul.mubr.msk.bf16.vlgmr.msra.gmra.mrb[4].mxu1 %vm617_vm1, %v727_v31 }
 0x4f5   : > { %778 = sbr.rel (%p1131_p9) target bundleno = 1276 (0x4fc), region = 60 }
 0x4f8   : > { %v769_v35 = vpop.f32.mrb[4].mxu1 }
 0x4f9   : > { %v1179_v36 = vpop.f32.mrb[5].mxu1 }
 0x4fa   : > { %v772_v37 = vpop.f32.mrb[6].mxu1 }
 0x4fb   : > { %v1180_v38 = vpop.f32.mrb[7].mxu1 }
 0x4fc PF: > { %v780_v40 = vld [vmem:[#allocation2] sm:$0xff]  ;;  %p1132_p6 = scmp.ne.s32.totalorder %s1500_s19, 3 }
 0x4fd   : > { %v781_v41 = vadd.f32 %v780_v40, %v769_v35  ;;  %v788_v43 = vld [vmem:[%s1781_s7] sm:$0xff] (!%p1132_p6)  ;;  %s2038_s29 = sld [smem:[#allocation28_spill]] (!%p1132_p6) }
 0x4fe   : > { %786 = sbr.rel (%p1132_p6) target bundleno = 1603 (0x643), region = 64  ;;  %v1133_v55 = vld [vmem:[%s1981_s6] ss:$0 sm:$0xff] (!%p1132_p6) }
 0x4ff   : > { %782 = vst.msk [vmem:[#allocation2] sm:$0xff] %vm570_vm2, %v781_v41 }
 0x503   : > { %v1134_v57 = vld [vmem:[%s2038_s29] ss:$0 sm:$0xff] (!%p1132_p6) }
 0x506   : > { %v787_v42 = vld [vmem:[#allocation2] sm:$0xff] }
 0x507   : > { %v789_v44 = vadd.f32 %v788_v43, %v787_v42 }
 0x509   : > { %v790_v45 = vsel %vm570_vm2, %v789_v44, 0.0 }
 0x50a   : > { %791 = vadd.xlane.f32.xlu0 %v790_v45 }
 0x597   : > { %v792_v46 = vpop.xlane.xlu0 %791 }
 0x598   : > { %v794_v47 = vmul.f32 0.03125, %v792_v46 }
 0x59a   : > { %v795_v48 = vsub.f32 %v789_v44, %v794_v47 }
 0x59c   : > { %v796_v49 = vmul.f32 %v795_v48, %v795_v48 }
 0x59e   : > { %v797_v50 = vsel %vm570_vm2, %v796_v49, 0.0 }
 0x59f   : > { %798 = vadd.xlane.f32.xlu0 %v797_v50 }
 0x62c   : > { %v799_v51 = vpop.xlane.xlu0 %798 }
 0x62d   : > { %v800_v52 = vmul.f32 0.03125, %v799_v51 }
 0x62f   : > { %v801_v53 = vadd.f32 1e-06, %v800_v52 }
 0x631   : > { %1302 = vrsqrt.f32 %v801_v53 }
 0x63b   : > { %v1303_v54 = vpop.eup %1302 }
 0x63c   : > { %v803_v56 = vmul.f32 %v1303_v54, %v795_v48 }
 0x63e   : > { %v811_v58 = vmul.f32 %v1133_v55, %v803_v56 }
 0x640   : > { %v819_v59 = vadd.f32 %v1134_v57, %v811_v58 }
 0x642   : > { %820 = vst.msk [vmem:[%s1824_s13] sm:$0xff] %vm570_vm2, %v819_v59 }
 0x643 PF: > { %s826_s9 = sand.u32 1, %s1636_s24   ;;  %s1139_s21 = sshll.u32 %s1504_s20, 2 }
 0x644   : > { %s1844_s30 = sadd.s32 %s1500_s19, %s1139_s21  ;;  %s862_s18 = sshll.u32 %s512_s10, 4  ;;  %s863_s18 = int_to_ptr.vmem [resolvable:$true] %s862_s18 }
 0x645   : > { %s1140_s25 = sshll.u32 %s1844_s30, 6  ;;  %s2039_s7 = sld [smem:[#allocation30_spill]] }
 0x646   : > { %s1856_s29 = scalar_lea.sflag [#allocation8], %s826_s9  ;;  %s1334_s17 = scalar_lea.vmem %s863_s18, 64 }
 0x647   : > { %p1335_p13 = scmp.ne.s32.totalorder %s863_s18, %s1334_s17  ;;  %p2040_p1 = scmp.ne.s32.totalorder %s2026_s27, 0 }
 0x648   : > { %s1522_s19 = smov [#allocation7]  }
 0x649   : > { %p1336_p12 = pnand %p1335_p13, %p2040_p1  ;;  %s1338_s24 = sshll.u32 %s1522_s19, 4  ;;  %s1339_s24 = int_to_ptr.vmem [resolvable:$false] %s1338_s24 }
 0x64a   : > { %s1340_s21 = scalar_lea.vmem %s1339_s24, 128  ;;  %p1341_p3 = scmp.lt.s32.totalorder %s863_s18, %s1339_s24 }
 0x64b   : > { %s1854_s22 = scalar_lea.hbm %s2039_s7, %s1140_s25  ;;  %p1337_p0 = pneg %p1336_p12 }
 0x64c   : > { %p1342_p5 = scmp.lt.s32.totalorder %s1340_s21, %s1334_s17 }
 0x64e   : > { %p1343_p7 = por %p1342_p5, %p1341_p3 }
 0x650   : > { %p1344_p11 = pnand %p1343_p7, %p1337_p0 }
 0x652   : > { %1347 = shalt.err (!%p1344_p11)
}
 0x653   : > { %s1348_s10 = scalar_lea.hbm %s1854_s22, 64  ;;  %s1352_s8 = scalar_lea.hbm %s2039_s7, 512 }
 0x654   : > { %p1349_p4 = scmp.ne.s32.totalorder %s1854_s22, %s1348_s10  ;;  %p1353_p2 = scmp.lt.u32.totalorder %s1854_s22, %s2039_s7 }
 0x655   : > { %p1354_p9 = scmp.lt.u32.totalorder %s1352_s8, %s1348_s10  ;;  %p1356_p13 = scmp.lt.u32.totalorder %s1348_s10, %s1854_s22 }
 0x656   : > { %p1350_p8 = pnand %p1349_p4, %p2040_p1 }
 0x657   : > { %p1355_p6 = por %p1354_p9, %p1353_p2 }
 0x658   : > { %p1351_p10 = pneg %p1350_p8 }
 0x659   : > { %p1357_p12 = por %p1356_p13, %p1355_p6 }
 0x65b   : > { %p1358_p0 = pnand %p1357_p12, %p1351_p10 }
 0x65d   : > { %1361 = shalt.err (!%p1358_p0)
}
 0x65e   : > { %s2041_s17 = sld [smem:[#allocation20_spill]]  ;;  %s1138_s21 = sshll.u32 %s1504_s20, 7 }
 0x65f   : > { %1184 = dma.vmem_to_hbm [thread:$0]  (%p2040_p1), %s863_s18, 64, %s1854_s22, %s1856_s29  }
 0x660   : > { %s2042_s19 = sld [smem:[#allocation29_spill]]  ;;  %s846_s10 = sshll.u32 %s1824_s13, 4  ;;  %s1883_s10 = int_to_ptr.vmem [resolvable:$true] %s846_s10 }
 0x661   : > { %s2044_s3 = sld [smem:[#allocation31_spill]]  ;;  %s822_s5 = scalar_lea.sflag [#allocation5], %s1755_s28 }
 0x662   : > { %s1362_s18 = scalar_lea.vmem %s1883_s10, 128  ;;  %s1523_s20 = smov [#allocation6]  }
 0x663   : > { %p1363_p3 = scmp.ne.s32.totalorder %s1883_s10, %s1362_s18  ;;  %s1366_s22 = sshll.u32 %s1523_s20, 4  ;;  %s1367_s22 = int_to_ptr.vmem [resolvable:$false] %s1366_s22 }
 0x664   : > { %p2045_p5 = scmp.ne.s32.totalorder %s2041_s17, 0  ;;  %s1368_s13 = scalar_lea.vmem %s1367_s22, 256 }
 0x665   : > { %p1369_p4 = scmp.lt.s32.totalorder %s1883_s10, %s1367_s22  ;;  %p1370_p8 = scmp.lt.s32.totalorder %s1368_s13, %s1362_s18 }
 0x666   : > { %s2043_s24 = smov %s2042_s19  ;;  %s1880_s8 = scalar_lea.hbm %s2042_s19, %s1138_s21 }
 0x667   : > { %s1890_s4 = scalar_lea.hbm %s2044_s3, %s1140_s25  ;;  %p1364_p7 = pnand %p1363_p3, %p2045_p5 }
 0x668   : > { %p1371_p10 = por %p1370_p8, %p1369_p4 }
 0x669   : > { %p1365_p11 = pneg %p1364_p7 }
 0x66b   : > { %p1372_p2 = pnand %p1371_p10, %p1365_p11 }
 0x66d   : > { %1375 = shalt.err (!%p1372_p2)
}
 0x66e   : > { %s1376_s0 = scalar_lea.hbm %s1880_s8, 128  ;;  %s1380_s30 = scalar_lea.hbm %s2043_s24, 256 }
 0x66f   : > { %p1377_p9 = scmp.ne.s32.totalorder %s1880_s8, %s1376_s0  ;;  %p1381_p12 = scmp.lt.u32.totalorder %s1880_s8, %s2043_s24 }
 0x670   : > { %p1382_p0 = scmp.lt.u32.totalorder %s1380_s30, %s1376_s0  ;;  %p1384_p7 = scmp.lt.u32.totalorder %s1376_s0, %s1880_s8 }
 0x671   : > { %p1378_p6 = pnand %p1377_p9, %p2045_p5 }
 0x672   : > { %p1383_p3 = por %p1382_p0, %p1381_p12 }
 0x673   : > { %p1379_p13 = pneg %p1378_p6 }
 0x674   : > { %p1385_p11 = por %p1384_p7, %p1383_p3 }
 0x676   : > { %p1386_p4 = pnand %p1385_p11, %p1379_p13 }
 0x678   : > { %1389 = shalt.err (!%p1386_p4)
}
 0x679   : > { %1183 = dma.vmem_to_hbm [thread:$0]  (%p2045_p5), %s1883_s10, 128, %s1880_s8, %s822_s5  }
 0x67a   : > { %s2046_s9 = scalar_lea.vmem [#allocation9], %s1799_s11  ;;  %s1524_s18 = smov [#allocation9]  }
 0x67b   : > { %s878_s1 = sshll.u32 %s2046_s9, 4  ;;  %s1394_s20 = sshll.u32 %s1524_s18, 4  ;;  %s879_s1 = int_to_ptr.vmem [resolvable:$true] %s878_s1  ;;  %s1395_s20 = int_to_ptr.vmem [resolvable:$false] %s1394_s20 }
 0x67c   : > { %s1390_s19 = scalar_lea.vmem %s879_s1, 64  ;;  %s1396_s22 = scalar_lea.vmem %s1395_s20, 128 }
 0x67d   : > { %p1391_p8 = scmp.ne.s32.totalorder %s879_s1, %s1390_s19  ;;  %p1397_p9 = scmp.lt.s32.totalorder %s879_s1, %s1395_s20 }
 0x67e   : > { %p1398_p6 = scmp.lt.s32.totalorder %s1396_s22, %s1390_s19 }
 0x67f   : > { %p1392_p10 = pnand %p1391_p8, %p2040_p1 }
 0x680   : > { %p1399_p13 = por %p1398_p6, %p1397_p9 }
 0x681   : > { %p1393_p2 = pneg %p1392_p10 }
 0x683   : > { %p1400_p12 = pnand %p1399_p13, %p1393_p2 }
 0x685   : > { %1403 = shalt.err (!%p1400_p12)
}
 0x686   : > { %s1404_s5 = scalar_lea.hbm %s1890_s4, 64  ;;  %s1408_s8 = scalar_lea.hbm %s2044_s3, 512 }
 0x687   : > { %p1405_p5 = scmp.ne.s32.totalorder %s1890_s4, %s1404_s5  ;;  %p1409_p7 = scmp.lt.u32.totalorder %s1890_s4, %s2044_s3 }
 0x688   : > { %p1410_p11 = scmp.lt.u32.totalorder %s1408_s8, %s1404_s5  ;;  %p1412_p8 = scmp.lt.u32.totalorder %s1404_s5, %s1890_s4 }
 0x689   : > { %p1406_p0 = pnand %p1405_p5, %p2040_p1 }
 0x68a   : > { %p1411_p4 = por %p1410_p11, %p1409_p7 }
 0x68b   : > { %p1407_p3 = pneg %p1406_p0 }
 0x68c   : > { %p1413_p10 = por %p1412_p8, %p1411_p4 }
 0x68e   : > { %p1414_p2 = pnand %p1413_p10, %p1407_p3 }
 0x690   : > { %1417 = shalt.err (!%p1414_p2)
}
 0x691   : > { %1185 = dma.vmem_to_hbm [thread:$0]  (%p2040_p1), %s879_s1, 64, %s1890_s4, %s1856_s29  }
 0x692 PF: > { %s2047_s0 = sld [smem:[#allocation13_spill]]  ;;  %p1204_p9 = scmp.ge.s32.totalorder %s1516_s23, 2 }
 0x693   : > { %p2048_p6 = scmp.ne.s32.totalorder %s2024_s16, 0 }
 0x695   : > { %p1194_p13 = pnand %p1204_p9, %p2048_p6 }
 0x698   : > { %s890_s2 = sand.u32 1, %s2047_s0  }
 0x699   : > { %s891_s28 = scalar_lea.sflag [#allocation5], %s890_s2 }
 0x69a   : > { %1467 = dma.done.wait (!%p1194_p13), %s891_s28, 128  }
 0x69b   : > { %1469 = vsyncadd (!%p1194_p13), %s891_s28, 4294967168  ;;  %s2049_s30 = sadd.s32 4294967294, %s1516_s23   ;;  %p2050_p12 = scmp.ne.s32.totalorder %s2027_s26, 0 }
 0x69c   : > { %s899_s25 = sand.u32 1, %s2049_s30  }
 0x69d   : > { %p1197_p5 = pnand %p1204_p9, %p2050_p12  ;;  %s900_s27 = scalar_lea.sflag [#allocation8], %s899_s25 }
 0x69f   : > { %1471 = dma.done.wait (!%p1197_p5), %s900_s27, 128  }
 0x6a0   : > { %1473 = vsyncadd (!%p1197_p5), %s900_s27, 4294967168  ;;  %s30_s23 = sadd.s32 1, %s1516_s23   ;;  %s2051_s16 = sld [smem:[#allocation14_spill]] }
 0x6a1   : > { %p27_p1 = scmp.ge.s32.totalorder %s30_s23, 10   ;;  %s2052_s17 = sld [smem:[#allocation15_spill]] }
 0x6a2   : > { %s2053_s18 = sld [smem:[#allocation21_spill]]  ;;  %s2054_s19 = sld [smem:[#allocation16_spill]] }
 0x6a3   : > { %s2055_s20 = sld [smem:[#allocation17_spill]]  ;;  %s2056_s21 = sld [smem:[#allocation18_spill]] }
 0x6a4   : > { %s2057_s22 = sld [smem:[#allocation19_spill]]  ;;  %s2058_s13 = smov %s1480_s14 }
 0x6a5   : > { %s2059_s14 = smov %s1484_s15  ;;  %s2060_s15 = smov %s1693_s12 }
 0x6a6   :  { %29 = sbr.rel (!%p27_p1) target bundleno = 22 (0x16), region = 152 }
 0x6ad   :  { %914 = vsyncpa [#allocation4], 1 }
 0x6ae   :  { %916 = vsyncpa [#allocation4 + $0x1], 1 }
 0x6af   :  { %917 = vsyncpa [#allocation5], 1 }
 0x6b0   :  { %919 = vsyncpa [#allocation5 + $0x1], 1 }
 0x6b1   :  { %920 = vsyncpa [#allocation8], 1 }
 0x6b2   :  { %922 = vsyncpa [#allocation8 + $0x1], 1 }

</bundles_post_ra>
